<compile_context>
chip_gen: v5e
topology: v5e:2x2
jax: 0.10.0
libtpu: 0.0.40
codegen_flags: <defaults>
</compile_context>

<pallas_src>
import functools

import numpy as np

import jax
import jax.numpy as jnp
from jax import lax
from jax.experimental import pallas as pl
from jax.experimental.pallas import tpu as pltpu

_VMEM_LIMIT = 32 * 1024 * 1024   # explicit; safe on v5e / v6e / v7x


def _round_up(v, m):
    return ((v + m - 1) // m) * m


# ---------------------------------------------------------------------------
# Stage 1: fused channel mean / max pooling.
# ---------------------------------------------------------------------------
def _pool_kernel(x_ref, o_ref, *, inv_c):
    # x_ref: (C, tS)   o_ref: (2, tS) f32   [leading batch dim squeezed away]
    x = x_ref[...]
    mean = jnp.sum(x, axis=0, dtype=jnp.float32, keepdims=True) * inv_c
    mx = jnp.max(x, axis=0, keepdims=True).astype(jnp.float32)
    o_ref[...] = jnp.concatenate([mean, mx], axis=0)   # single (2, tS) store


def _pick_spatial_tile(S, C, itemsize, target_bytes):
    """Lane tile for the (C, tS) streamed input block.

    Returns either the full spatial extent S (always a legal block) when it
    fits the byte budget, or the largest multiple-of-128 tile <= budget
    (the tail block is partial; out-of-bounds lanes are masked on store).
    """
    cap = max(128, (target_bytes // max(1, C * itemsize)) // 128 * 128)
    if S <= cap:
        return S
    return min(cap, (S // 128) * 128)


# ---------------------------------------------------------------------------
# Stage 2: k x k x k conv (2 -> 1 channels, no bias) + sigmoid, via K matmuls
# against precomputed band matrices (all (c, kh, kw) taps folded in).
# ---------------------------------------------------------------------------
def _conv_sigmoid_kernel(p_ref, b_ref, o_ref, *, K, D):
    # p_ref: (Dp, 2*Hp*Wp)  zero-padded pooled sample (channel-major columns)
    # b_ref: (K, 2*Hp*Wp, H*W) band matrices, one per depth tap
    # o_ref: (D, H*W)        lane-dense output slab
    acc = jnp.zeros(o_ref.shape, jnp.float32)
    for kd in range(K):                       # K MXU matmuls; no per-tap slicing
        win = p_ref[kd:kd + D, :]             # (D, 2*Hp*Wp) depth window
        acc = acc + jnp.dot(win, b_ref[kd], preferred_element_type=jnp.float32)
    # sigmoid; the divide is negligible next to the MXU work in this stage.
    o_ref[...] = (1.0 / (1.0 + jnp.exp(-acc))).astype(o_ref.dtype)


def _build_band_matrices(w, K, H, W, pad):
    """B[kd, c*Hp*Wp + (h+kh)*Wp + (w+kw), h*W + w] = weight[c, kd, kh, kw]."""
    Hp, Wp = H + 2 * pad, W + 2 * pad
    c_i, kd_i, kh_i, kw_i, h_i, w_i = np.meshgrid(
        np.arange(2), np.arange(K), np.arange(K), np.arange(K),
        np.arange(H), np.arange(W), indexing="ij")
    rows = c_i * (Hp * Wp) + (h_i + kh_i) * Wp + (w_i + kw_i)
    cols = h_i * W + w_i
    vals = w.astype(jnp.float32)[c_i, kd_i, kh_i, kw_i]
    band = jnp.zeros((K, 2 * Hp * Wp, H * W), jnp.float32)
    return band.at[kd_i, rows, cols].add(vals)


# ---------------------------------------------------------------------------
# Wrapper
# ---------------------------------------------------------------------------
def spatial_attention(x, conv_weight, *, spatial_block_bytes=8 * 1024 * 1024):
    """x: (N, C, D, H, W).  conv_weight: (1, 2, K, K, K) or (2, K, K, K).

    Returns sigmoid(conv3d(cat([mean_c(x), max_c(x)], 1))) with shape
    (N, 1, D, H, W), matching the PyTorch SpatialAttention forward.
    """
    N, C, D, H, W = x.shape
    w = conv_weight
    if w.ndim == 5:                    # PyTorch Conv3d layout (O, I, kD, kH, kW)
        w = w[0]
    K = int(w.shape[-1])
    assert w.shape == (2, K, K, K) and K in (3, 7)
    pad = 3 if K == 7 else 1
    S = D * H * W
    Dp, Hp, Wp = D + 2 * pad, H + 2 * pad, W + 2 * pad
    HW = H * W

    # ---- stage 1: channel mean/max pooling, tiled along S ------------------
    tS = _pick_spatial_tile(S, C, x.dtype.itemsize, spatial_block_bytes)
    # Guarantee >= 2 "parallel" grid steps (keeps both v7x TensorCores busy).
    if N * (-(-S // tS)) < 2 and S > 128:
        tS = _round_up(-(-S // 2), 128)
    grid_s = pl.cdiv(S, tS)

    x_flat = x.reshape(N, C, S)
    pool_kernel = functools.partial(_pool_kernel, inv_c=1.0 / C)
    pooled = pl.pallas_call(
        pool_kernel,
        out_shape=jax.ShapeDtypeStruct((N, 2, S), jnp.float32),
        grid_spec=pltpu.PrefetchScalarGridSpec(
            num_scalar_prefetch=0,
            grid=(N, grid_s),
            in_specs=[
                pl.BlockSpec((pl.Squeezed(), C, tS), lambda n, s: (n, 0, s)),
            ],
            out_specs=pl.BlockSpec((pl.Squeezed(), 2, tS), lambda n, s: (n, 0, s)),
        ),
        compiler_params=pltpu.CompilerParams(
            dimension_semantics=("parallel", "parallel"),
            vmem_limit_bytes=_VMEM_LIMIT,
        ),
    )(x_flat)

    # ---- glue on the tiny pooled tensor: pad + channel-major flatten -------
    # TODO(synk): this zero-pad / relayout could be fused into stage 1's
    # output index_map to save ~2 extra HBM passes over the pooled tensor
    # (only matters for very small C).
    pooled = pooled.reshape(N, 2, D, H, W)
    pooled_pad = jnp.pad(
        pooled, ((0, 0), (0, 0), (pad, pad), (pad, pad), (pad, pad)))
    p_in = pooled_pad.transpose(0, 2, 1, 3, 4).reshape(N, Dp, 2 * Hp * Wp)

    band = _build_band_matrices(w, K, H, W, pad)        # (K, 2*Hp*Wp, HW)

    # ---- stage 2: conv + sigmoid, one sample per (parallel) grid step ------
    conv_kernel = functools.partial(_conv_sigmoid_kernel, K=K, D=D)
    out = pl.pallas_call(
        conv_kernel,
        out_shape=jax.ShapeDtypeStruct((N, D, HW), jnp.float32),
        grid_spec=pltpu.PrefetchScalarGridSpec(
            num_scalar_prefetch=0,
            grid=(N,),
            in_specs=[
                pl.BlockSpec((pl.Squeezed(), Dp, 2 * Hp * Wp),
                             lambda n: (n, 0, 0)),
                # constant index_map -> fetched once, not re-DMA'd per sample
                pl.BlockSpec((K, 2 * Hp * Wp, HW), lambda n: (0, 0, 0)),
            ],
            out_specs=pl.BlockSpec((pl.Squeezed(), D, HW), lambda n: (n, 0, 0)),
        ),
        compiler_params=pltpu.CompilerParams(
            dimension_semantics=("parallel",),
            vmem_limit_bytes=_VMEM_LIMIT,
        ),
    )(p_in, band)

    return out.reshape(N, 1, D, H, W)


# ---------------------------------------------------------------------------
# Pure-JAX reference mirroring the PyTorch forward.
# ---------------------------------------------------------------------------
def spatial_attention_ref(x, conv_weight):
    w = conv_weight if conv_weight.ndim == 5 else conv_weight[None]
    K = w.shape[-1]
    pad = 3 if K == 7 else 1
    avg = jnp.mean(x, axis=1, keepdims=True)
    mx = jnp.max(x, axis=1, keepdims=True)
    xin = jnp.concatenate([avg, mx], axis=1)            # (N, 2, D, H, W)
    y = lax.conv_general_dilated(
        xin, w, window_strides=(1, 1, 1), padding=[(pad, pad)] * 3,
        dimension_numbers=("NCDHW", "OIDHW", "NCDHW"))
    return jax.nn.sigmoid(y)


if __name__ == "__main__":
    key = jax.random.PRNGKey(0)

    # --- main check: default module config (kernel_size=7), multi-tile S ----
    N, C, D, H, W = 2, 16, 16, 16, 16
    K = 7
    kx, kw, kx2, kw2 = jax.random.split(key, 4)
    x = jax.random.normal(kx, (N, C, D, H, W), dtype=jnp.float32)
    conv_weight = jax.random.normal(kw, (1, 2, K, K, K), dtype=jnp.float32) * 0.05

    # Small spatial block budget so the S-tiling path (grid = (2, 4)) is
    # exercised even at this small test shape.
    out = spatial_attention(x, conv_weight, spatial_block_bytes=64 * 1024)
    out = jax.block_until_ready(out)
    ref = spatial_attention_ref(x, conv_weight)
    assert out.shape == (N, 1, D, H, W)
    max_err = float(jnp.max(jnp.abs(out - ref)))
    assert jnp.allclose(out, ref, atol=1e-4, rtol=1e-4), max_err

    # --- robustness check: kernel_size=3, N=1, S not a multiple of 128 ------
    N2, C2, D2, H2, W2 = 1, 5, 5, 10, 10
    K2 = 3
    x2 = jax.random.normal(kx2, (N2, C2, D2, H2, W2), dtype=jnp.float32)
    conv_weight2 = jax.random.normal(kw2, (1, 2, K2, K2, K2), dtype=jnp.float32) * 0.1
    out2 = jax.block_until_ready(spatial_attention(x2, conv_weight2))
    ref2 = spatial_attention_ref(x2, conv_weight2)
    assert out2.shape == (N2, 1, D2, H2, W2)
    max_err2 = float(jnp.max(jnp.abs(out2 - ref2)))
    assert jnp.allclose(out2, ref2, atol=1e-4, rtol=1e-4), max_err2

    print("KERNEL_OK")
</pallas_src>

<mosaic_0001>
module attributes {stable_mosaic.version = 11 : i64} {
  func.func @_pool_kernel(%arg0: i32, %arg1: i32, %arg2: memref<1x16x1024xf32, #tpu.memory_space<vmem>>, %arg3: memref<1x2x1024xf32, #tpu.memory_space<vmem>>) attributes {dimension_semantics = [#tpu.dimension_semantics<parallel>, #tpu.dimension_semantics<parallel>], iteration_bounds = array<i64: 2, 4>, scalar_prefetch = 0 : i64, scratch_operands = 0 : i64, tpu.core_type = #tpu.core_type<tc>, window_params = [{transform_indices = @transform_0, window_bounds = array<i64: 1, 16, 1024>}, {transform_indices = @transform_1, window_bounds = array<i64: 1, 2, 1024>}]} {
    %c0 = arith.constant 0 : index
    %c0_0 = arith.constant 0 : index
    %c0_1 = arith.constant 0 : index
    %0 = vector.load %arg2[%c0, %c0_0, %c0_1] : memref<1x16x1024xf32, #tpu.memory_space<vmem>>, vector<1x16x1024xf32>
    %1 = vector.shape_cast %0 : vector<1x16x1024xf32> to vector<16x1024xf32>
    %cst = arith.constant dense<0.000000e+00> : vector<1024xf32>
    %2 = vector.multi_reduction <add>, %1, %cst [0] : vector<16x1024xf32> to vector<1024xf32>
    %3 = vector.shape_cast %2 : vector<1024xf32> to vector<1x1024xf32>
    %cst_2 = arith.constant 6.250000e-02 : f32
    %4 = vector.broadcast %cst_2 : f32 to vector<1x1024xf32>
    %5 = arith.mulf %3, %4 : vector<1x1024xf32>
    %cst_3 = arith.constant dense<0xFF800000> : vector<1024xf32>
    %6 = vector.multi_reduction <maximumf>, %1, %cst_3 [0] : vector<16x1024xf32> to vector<1024xf32>
    %7 = vector.shape_cast %6 : vector<1024xf32> to vector<1x1024xf32>
    %8 = tpu.concatenate %5, %7 in 0 : vector<1x1024xf32>, vector<1x1024xf32> -> vector<2x1024xf32>
    %c0_4 = arith.constant 0 : index
    %c0_5 = arith.constant 0 : index
    %c0_6 = arith.constant 0 : index
    %9 = vector.load %arg3[%c0_4, %c0_5, %c0_6] : memref<1x2x1024xf32, #tpu.memory_space<vmem>>, vector<1x2x1024xf32>
    %10 = vector.shape_cast %9 : vector<1x2x1024xf32> to vector<2x1024xf32>
    %11 = vector.shape_cast %8 : vector<2x1024xf32> to vector<1x2x1024xf32>
    tpu.vector_store %arg3[%c0_4, %c0_5, %c0_6], %11 {strides = array<i32>} : memref<1x2x1024xf32, #tpu.memory_space<vmem>>, vector<1x2x1024xf32>,
    return
  }
  func.func @transform_0(%arg0: i32, %arg1: i32) -> (i32, i32, i32) {
    %c0_i32 = arith.constant 0 : i32
    %c0_i32_0 = arith.constant 0 : i32
    return %arg0, %c0_i32, %arg1 : i32, i32, i32
  }
  func.func @transform_1(%arg0: i32, %arg1: i32) -> (i32, i32, i32) {
    %c0_i32 = arith.constant 0 : i32
    %c0_i32_0 = arith.constant 0 : i32
    return %arg0, %c0_i32, %arg1 : i32, i32, i32
  }
}

</mosaic_0001>

<bundles_post_ra>
// kernel: tpu_custom_call.1
= control target key start
LH: loop header
LB: loop body
LE: loop exit
PB: predicated region body
PF: predicated region fallthrough
CT: control target
= control target key end

     0   :  { %6 = vsyncpa [#allocation3], 0  ;;  %s856_s0 = inlined_call_operand.hbm [shape: f32[2,16,4096], index: 0, kind: input, shape index: {}]   ;;  %s857_s1 = inlined_call_operand.hbm [shape: f32[2,2,4096], index: 1, kind: output, shape index: {}]  }
   0x1   :  { %8 = vsyncpa [#allocation3 + $0x1], 0 }
   0x2   :  { %9 = vsyncpa [#allocation4], 0 }
   0x3   :  { %11 = vsyncpa [#allocation4 + $0x1], 0  ;;  %s676_s6 = smov 0   ;;  %s678_s7 = smov 0  }
   0x4   :  { %s680_s8 = smov 0   ;;  %s682_s9 = smov 0  }
   0x5   :  { %s684_s10 = smov 0   ;;  %s686_s11 = smov 0  }
   0x6   :  { %s688_s12 = smov 0   ;;  %s690_s13 = smov 0  }
   0x7 LB: > { %s435_s14 = sadd.s32 4294967295, %s661_s13   ;;  %s436_s15 = sadd.s32 4294967294, %s661_s13   ;;  %s661_s13 = sphi %s690_s13, %s17_s13   ;;  %s657_s12 = sphi %s688_s12, %s874_s12   ;;  %s653_s11 = sphi %s686_s11, %s873_s11   ;;  %s649_s10 = sphi %s684_s10, %s872_s10   ;;  %s645_s9 = sphi %s682_s9, %s871_s9   ;;  %s641_s8 = sphi %s680_s8, %s870_s8   ;;  %s637_s7 = sphi %s678_s7, %s869_s7   ;;  %s633_s6 = sphi %s676_s6, %s868_s6  }
   0x8   : > { %s26_s16 = sadd.s32 1, %s653_s11  ;;  %s29_s17 = sadd.s32 1, %s657_s12 }
   0x9   : > { %p27_p0 = scmp.ge.s32.totalorder %s26_s16, 4  ;;  %s38_s18 = sadd.s32 1, %s641_s8 }
   0xa   : > { %p45_p1 = scmp.ne.s32.totalorder %s641_s8, %s637_s7  ;;  %p46_p2 = scmp.eq.s32.totalorder %s661_s13, 0 }
   0xb   : > { %s876_s16 = smov (%p27_p0, %s26_s16), 0  ;;  %s878_s17 = smov (!%p27_p0, %s29_s17), %s657_s12 }
   0xc   : > { %860 = sst [smem:[#allocation8_spill]] %s876_s16  ;;  %s34_s19 = ssub.s32 %s653_s11, %s876_s16 }
   0xd   : > { %p729_p3 = por %p46_p2, %p45_p1  ;;  %p31_p4 = scmp.ge.s32.totalorder %s878_s17, 2 }
   0xe   : > { %p51_p5 = scmp.ne.s32.totalorder %s637_s7, %s633_s6  ;;  %p52_p6 = scmp.eq.s32.totalorder %s435_s14, 0 }
   0xf   : > { %p77_p7 = scmp.eq.s32.totalorder %s435_s14, 7  ;;  %s880_s17 = smov (%p31_p4, %s878_s17), 0 }
  0x10   : > { %862 = sst [smem:[#allocation9_spill]] %s880_s17  ;;  %p737_p8 = por %p52_p6, %p51_p5 }
  0x11   : > { %p741_p9 = por %p77_p7, %p45_p1  ;;  %s33_s23 = ssub.s32 %s657_s12, %s880_s17 }
  0x12   : > { %p83_p10 = scmp.eq.s32.totalorder %s436_s15, 7  ;;  %s35_s24 = sor.u32 %s34_s19, %s33_s23 }
  0x13   : > { %p36_p11 = scmp.eq.s32.totalorder %s35_s24, 0  ;;  %p464_p13 = scmp.lt.s32.totalorder %s661_s13, 8 }
  0x14   : > { %p747_p12 = por %p83_p10, %p51_p5  ;;  %s103_s26 = sand.u32 1, %s641_s8  }
  0x15   : > { %s754_s27 = scalar_select %p36_p11, %s641_s8, %s38_s18  }
  0x16   : > { %s439_s28 = sshll.u32 %s103_s26, 7  ;;  %s440_s29 = sshll.u32 %s653_s11, 3 }
  0x17   : > { %s441_s30 = sshll.u32 %s657_s12, 6  ;;  %s107_s2 = scalar_lea.vmem [#allocation2], %s439_s28 }
  0x18   : > { %s117_s3 = sshll.u32 %s107_s2, 4  ;;  %s112_s4 = sadd.s32 %s441_s30, %s440_s29  ;;  %s118_s3 = int_to_ptr.vmem [resolvable:$true] %s117_s3 }
  0x19   : > { %s442_s5 = sshll.u32 %s112_s4, 3  ;;  %p457_p0 = pnand %p464_p13, %p729_p3 }
  0x1a   : > { %s114_s19 = scalar_lea.hbm %s856_s0, %s442_s5  ;;  %p443_p1 = scmp.ge.s32.totalorder %s661_s13, 1 }
  0x1b   : > { %s115_s23 = sshll.u32 %s114_s19, 4  ;;  %s104_s18 = scalar_lea.sflag [#allocation3], %s103_s26  ;;  %s116_s23 = int_to_ptr.hbm [resolvable:$true] %s115_s23 }
  0x1c   : > { %s663_s24 = smov 4096   ;;  %s664_s17 = smov 1024  }
  0x1d   : > { %s665_s16 = smov 64   ;;  %p125_p2 = scmp.lt.s32.totalorder %s661_s13, 9 }
  0x1e   : > { %459 = dma.hbm_to_vmem [thread:$0]  (!%p457_p0), %s116_s23, 2048, %s118_s3, %s104_s18, %s663_s24, %s664_s17, %s665_s16  }
  0x1f   : > { %p126_p4 = pnand %p443_p1, %p125_p2 }
  0x20   : > { %s766_s28 = sand.u32 (!%p126_p4), 1, %s637_s7  }
  0x21   : > { %129 = sbr.rel (%p126_p4) target bundleno = 86 (0x56), region = 24  ;;  %s444_s20 = sshll.u32 (!%p126_p4), %s766_s28, 7 }
  0x22   : > { %s132_s29 = scalar_lea.sflag (!%p126_p4), [#allocation3], %s766_s28  ;;  %s770_s30 = scalar_lea.vmem (!%p126_p4), [#allocation2], %s444_s20 }
  0x26   : > { %624 = dma.done.wait (%p737_p8), %s132_s29, 2048  }
  0x27   : > { %626 = vsyncadd (%p737_p8), %s132_s29, 4294965248  ;;  %v157_v0 = vld [vmem:[%s770_s30] sm:$0xff]  ;;  %v158_v1 = vld [vmem:[%s770_s30 + $0x8] sm:$0xff]  ;;  %vm293_vm0 = vcmask 1040384   ;;  %vm316_vm1 = vcmask 1041408   ;;  %vm318_vm2 = vcmask 1045508  }
  0x28   : > { %v159_v2 = vld [vmem:[%s770_s30 + $0x10] sm:$0xff]  ;;  %v160_v3 = vld [vmem:[%s770_s30 + $0x18] sm:$0xff]  ;;  %v165_v4 = vld [vmem:[%s770_s30 + $0x40] sm:$0xff]  ;;  %vm320_vm3 = vcmask 1043456   ;;  %s445_s16 = sshll.u32 %s766_s28, 4  ;;  %s447_s21 = sshll.u32 %s645_s9, 3 }
  0x29   : > { %v166_v5 = vld [vmem:[%s770_s30 + $0x48] sm:$0xff]  ;;  %v167_v6 = vld [vmem:[%s770_s30 + $0x50] sm:$0xff]  ;;  %v168_v7 = vld [vmem:[%s770_s30 + $0x58] sm:$0xff]  ;;  %v173_v8 = vadd.f32 %v165_v4, %v157_v0  ;;  %v237_v10 = vmax.f32 %v157_v0, %v165_v4  ;;  %s800_s17 = scalar_lea.vmem [#allocation5], %s445_s16  ;;  %s448_s26 = sshll.u32 %s649_s10, 5 }
  0x2a   : > { %v180_v9 = vadd.f32 %v166_v5, %v158_v1  ;;  %v244_v11 = vmax.f32 %v158_v1, %v166_v5  ;;  %v187_v12 = vadd.f32 %v167_v6, %v159_v2  ;;  %v194_v13 = vadd.f32 %v168_v7, %v160_v3  ;;  %v161_v48 = vld [vmem:[%s770_s30 + $0x20] sm:$0xff]  ;;  %v162_v53 = vld [vmem:[%s770_s30 + $0x28] sm:$0xff]  ;;  %v163_v54 = vld [vmem:[%s770_s30 + $0x30] sm:$0xff]  ;;  %s341_s2 = sadd.s32 %s448_s26, %s447_s21  ;;  %s345_s5 = sshll.u32 %s800_s17, 4  ;;  %s346_s5 = int_to_ptr.vmem [resolvable:$true] %s345_s5 }
  0x2b   : > { %v251_v14 = vmax.f32 %v159_v2, %v167_v6  ;;  %v258_v15 = vmax.f32 %v160_v3, %v168_v7  ;;  %v174_v16 = vrot.slane %v173_v8, 4  ;;  %v238_v18 = vrot.slane %v237_v10, 4  ;;  %v169_v59 = vld [vmem:[%s770_s30 + $0x60] sm:$0xff]  ;;  %v170_v60 = vld [vmem:[%s770_s30 + $0x68] sm:$0xff]  ;;  %v164_v1 = vld [vmem:[%s770_s30 + $0x38] sm:$0xff]  ;;  %s449_s9 = sshll.u32 %s341_s2, 1 }
  0x2c   : > { %v181_v17 = vrot.slane %v180_v9, 4  ;;  %v245_v19 = vrot.slane %v244_v11, 4  ;;  %v188_v20 = vrot.slane %v187_v12, 4  ;;  %v195_v21 = vrot.slane %v194_v13, 4  ;;  %v171_v2 = vld [vmem:[%s770_s30 + $0x70] sm:$0xff]  ;;  %v172_v3 = vld [vmem:[%s770_s30 + $0x78] sm:$0xff]  ;;  %s343_s4 = scalar_lea.hbm %s857_s1, %s449_s9 }
  0x2d   : > { %v252_v22 = vrot.slane %v251_v14, 4  ;;  %v259_v23 = vrot.slane %v258_v15, 4  ;;  %v175_v24 = vadd.f32 %v174_v16, %v173_v8  ;;  %v239_v26 = vmax.f32 %v237_v10, %v238_v18  ;;  %s347_s14 = sshll.u32 %s343_s4, 4  ;;  %s330_s15 = scalar_lea.sflag [#allocation4], %s766_s28  ;;  %s348_s14 = int_to_ptr.hbm [resolvable:$true] %s347_s14 }
  0x2e   : > { %v182_v25 = vadd.f32 %v181_v17, %v180_v9  ;;  %v246_v27 = vmax.f32 %v244_v11, %v245_v19  ;;  %v189_v28 = vadd.f32 %v188_v20, %v187_v12  ;;  %v196_v29 = vadd.f32 %v195_v21, %v194_v13  ;;  %s577_s19 = sshra.s32 %s348_s14, 4  ;;  %s583_s20 = scalar_lea.hbm %s857_s1, 128  ;;  %s578_s19 = int_to_ptr.hbm [resolvable:$true] %s577_s19 }
  0x2f   : > { %v253_v30 = vmax.f32 %v251_v14, %v252_v22  ;;  %v260_v31 = vmax.f32 %v258_v15, %v259_v23  ;;  %v176_v32 = vrot.slane %v175_v24, 2  ;;  %v240_v34 = vrot.slane %v239_v26, 2  ;;  %s579_s23 = scalar_lea.hbm %s578_s19, 16  ;;  %p584_p7 = scmp.lt.s32.totalorder %s578_s19, %s857_s1 }
  0x30   : > { %v183_v33 = vrot.slane %v182_v25, 2  ;;  %v247_v35 = vrot.slane %v246_v27, 2  ;;  %v190_v36 = vrot.slane %v189_v28, 2  ;;  %v197_v37 = vrot.slane %v196_v29, 2  ;;  %p580_p3 = scmp.ne.s32.totalorder %s578_s19, %s579_s23  ;;  %p585_p8 = scmp.lt.s32.totalorder %s583_s20, %s579_s23 }
  0x31   : > { %v254_v38 = vrot.slane %v253_v30, 2  ;;  %v261_v39 = vrot.slane %v260_v31, 2  ;;  %v177_v40 = vadd.f32 %v176_v32, %v175_v24  ;;  %v241_v42 = vmax.f32 %v239_v26, %v240_v34 }
  0x32   : > { %v184_v41 = vadd.f32 %v183_v33, %v182_v25  ;;  %v248_v43 = vmax.f32 %v246_v27, %v247_v35  ;;  %v191_v44 = vadd.f32 %v190_v36, %v189_v28  ;;  %v198_v45 = vadd.f32 %v197_v37, %v196_v29  ;;  %p581_p5 = pnand %p580_p3, %p741_p9  ;;  %p586_p10 = por %p585_p8, %p584_p7 }
  0x33   : > { %v255_v46 = vmax.f32 %v253_v30, %v254_v38  ;;  %v262_v47 = vmax.f32 %v260_v31, %v261_v39  ;;  %v178_v49 = vrot.slane %v177_v40, 1  ;;  %v242_v51 = vrot.slane %v241_v42, 1 }
  0x34   : > { %v185_v50 = vrot.slane %v184_v41, 1  ;;  %v249_v52 = vrot.slane %v248_v43, 1  ;;  %v192_v55 = vrot.slane %v191_v44, 1  ;;  %v199_v56 = vrot.slane %v198_v45, 1  ;;  %p582_p6 = pneg %p581_p5 }
  0x35   : > { %v256_v57 = vrot.slane %v255_v46, 1  ;;  %v263_v58 = vrot.slane %v262_v47, 1  ;;  %v179_v61 = vadd.f32 %v178_v49, %v177_v40  ;;  %v243_v63 = vmax.f32 %v241_v42, %v242_v51 }
  0x36   : > { %v186_v62 = vadd.f32 %v185_v50, %v184_v41  ;;  %v250_v0 = vmax.f32 %v248_v43, %v249_v52  ;;  %v193_v4 = vadd.f32 %v192_v55, %v191_v44  ;;  %v200_v5 = vadd.f32 %v199_v56, %v198_v45  ;;  %p587_p11 = pnand %p586_p10, %p582_p6 }
  0x37   : > { %v257_v6 = vmax.f32 %v255_v46, %v256_v57  ;;  %v264_v7 = vmax.f32 %v262_v47, %v263_v58  ;;  %v229_v8 = vmul.f32 0.0625, %v179_v61  ;;  %v201_v10 = vadd.f32 %v169_v59, %v161_v48 }
  0x38   : > { %v230_v9 = vmul.f32 0.0625, %v186_v62  ;;  %v208_v11 = vadd.f32 %v170_v60, %v162_v53  ;;  %v231_v12 = vmul.f32 0.0625, %v193_v4  ;;  %v232_v13 = vmul.f32 0.0625, %v200_v5 }
  0x39   : > { %v215_v14 = vadd.f32 %v171_v2, %v163_v54  ;;  %v222_v15 = vadd.f32 %v172_v3, %v164_v1  ;;  %v294_v16 = vsel %vm293_vm0, %v229_v8, %v243_v63  ;;  %v202_v18 = vrot.slane %v201_v10, 4 }
  0x3a   : > { %v295_v17 = vsel %vm293_vm0, %v230_v9, %v250_v0  ;;  %v209_v19 = vrot.slane %v208_v11, 4  ;;  %v296_v20 = vsel %vm293_vm0, %v231_v12, %v257_v6  ;;  %v297_v21 = vsel %vm293_vm0, %v232_v13, %v264_v7 }
  0x3b   : > { %v310_v22 = vrot.slane %v295_v17, 6  ;;  %v216_v23 = vrot.slane %v215_v14, 4  ;;  %v311_v24 = vrot.slane %v296_v20, 4  ;;  %v312_v25 = vrot.slane %v297_v21, 2 }
  0x3c   : > { %v203_v26 = vadd.f32 %v202_v18, %v201_v10  ;;  %v210_v27 = vadd.f32 %v209_v19, %v208_v11  ;;  %v223_v30 = vrot.slane %v222_v15, 4  ;;  %v265_v31 = vmax.f32 %v161_v48, %v169_v59 }
  0x3d   : > { %v317_v28 = vsel %vm316_vm1, %v294_v16, %v310_v22  ;;  %v217_v29 = vadd.f32 %v216_v23, %v215_v14  ;;  %v319_v32 = vsel %vm318_vm2, %v311_v24, %v312_v25  ;;  %v272_v35 = vmax.f32 %v162_v53, %v170_v60 }
  0x3e   : > { %v204_v33 = vrot.slane %v203_v26, 2  ;;  %v211_v34 = vrot.slane %v210_v27, 2  ;;  %v321_v36 = vsel %vm320_vm3, %v317_v28, %v319_v32  ;;  %v224_v38 = vadd.f32 %v223_v30, %v222_v15 }
  0x3f   : > { %v218_v37 = vrot.slane %v217_v29, 2  ;;  %v266_v39 = vrot.slane %v265_v31, 4  ;;  %327 = vst [vmem:[%s800_s17] sm:$0xff] %v321_v36  ;;  %v273_v42 = vrot.slane %v272_v35, 4  ;;  %v279_v43 = vmax.f32 %v163_v54, %v171_v2 }
  0x40   : > { %v205_v40 = vadd.f32 %v204_v33, %v203_v26  ;;  %v212_v41 = vadd.f32 %v211_v34, %v210_v27  ;;  %v225_v45 = vrot.slane %v224_v38, 2  ;;  %v286_v47 = vmax.f32 %v164_v1, %v172_v3 }
  0x41   : > { %v219_v44 = vadd.f32 %v218_v37, %v217_v29  ;;  %v267_v46 = vmax.f32 %v265_v31, %v266_v39  ;;  %v274_v50 = vmax.f32 %v272_v35, %v273_v42  ;;  %v280_v51 = vrot.slane %v279_v43, 4 }
  0x42   : > { %v206_v48 = vrot.slane %v205_v40, 1  ;;  %v213_v49 = vrot.slane %v212_v41, 1  ;;  %v226_v53 = vadd.f32 %v225_v45, %v224_v38  ;;  %v287_v56 = vrot.slane %v286_v47, 4 }
  0x43   : > { %v220_v52 = vrot.slane %v219_v44, 1  ;;  %v268_v55 = vrot.slane %v267_v46, 2  ;;  %v275_v58 = vrot.slane %v274_v50, 2  ;;  %v281_v59 = vmax.f32 %v279_v43, %v280_v51 }
  0x44   : > { %v214_v57 = vadd.f32 %v213_v49, %v212_v41  ;;  %v207_v60 = vadd.f32 %v206_v48, %v205_v40  ;;  %v227_v61 = vrot.slane %v226_v53, 1  ;;  %v288_v62 = vmax.f32 %v286_v47, %v287_v56 }
  0x45   : > { %v269_v54 = vmax.f32 %v267_v46, %v268_v55  ;;  %v221_v63 = vadd.f32 %v220_v52, %v219_v44  ;;  %v276_v0 = vmax.f32 %v274_v50, %v275_v58  ;;  %v282_v1 = vrot.slane %v281_v59, 2 }
  0x46   : > { %v228_v2 = vadd.f32 %v227_v61, %v226_v53  ;;  %v289_v4 = vrot.slane %v288_v62, 2  ;;  %v234_v5 = vmul.f32 0.0625, %v214_v57  ;;  %v233_v8 = vmul.f32 0.0625, %v207_v60 }
  0x47   : > { %v270_v3 = vrot.slane %v269_v54, 1  ;;  %v277_v6 = vrot.slane %v276_v0, 1  ;;  %v283_v7 = vmax.f32 %v281_v59, %v282_v1  ;;  %v235_v11 = vmul.f32 0.0625, %v221_v63 }
  0x48   : > { %v290_v10 = vmax.f32 %v288_v62, %v289_v4  ;;  %v236_v14 = vmul.f32 0.0625, %v228_v2 }
  0x49   : > { %v271_v9 = vmax.f32 %v269_v54, %v270_v3  ;;  %v278_v12 = vmax.f32 %v276_v0, %v277_v6  ;;  %v284_v13 = vrot.slane %v283_v7, 1 }
  0x4a   : > { %v291_v15 = vrot.slane %v290_v10, 1 }
  0x4b   : > { %v285_v16 = vmax.f32 %v283_v7, %v284_v13  ;;  %v299_v17 = vsel %vm293_vm0, %v234_v5, %v278_v12  ;;  %v298_v19 = vsel %vm293_vm0, %v233_v8, %v271_v9 }
  0x4c   : > { %v292_v18 = vmax.f32 %v290_v10, %v291_v15  ;;  %v313_v20 = vrot.slane %v299_v17, 6 }
  0x4d   : > { %v300_v21 = vsel %vm293_vm0, %v235_v11, %v285_v16 }
  0x4e   : > { %v301_v22 = vsel %vm293_vm0, %v236_v14, %v292_v18  ;;  %v314_v23 = vrot.slane %v300_v21, 4  ;;  %v322_v25 = vsel %vm316_vm1, %v298_v19, %v313_v20 }
  0x4f   : > { %v315_v24 = vrot.slane %v301_v22, 2 }
  0x51   : > { %v323_v26 = vsel %vm318_vm2, %v314_v23, %v315_v24 }
  0x52   : > { %v324_v27 = vsel %vm320_vm3, %v322_v25, %v323_v26 }
  0x53   : > { %328 = vst [vmem:[%s800_s17 + $0x8] sm:$0xff] %v324_v27 }
  0x54   : > { %590 = shalt.err (!%p587_p11)
}
  0x55   : > { %454 = dma.vmem_to_hbm [thread:$0]  (%p741_p9), %s346_s5, 256, %s348_s14, %s330_s15  }
  0x56 PF: > { %p465_p13 = scmp.ge.s32.totalorder %s661_s13, 2  ;;  %s359_s28 = sand.u32 1, %s633_s6  }
  0x57   : > { %s360_s16 = scalar_lea.sflag [#allocation4], %s359_s28 }
  0x58   : > { %p461_p0 = pnand %p465_p13, %p747_p12 }
  0x5a   : > { %p462_p1 = pneg %p461_p0 }
  0x5c   : > { %628 = dma.done.wait (%p462_p1), %s360_s16, 256  }
  0x5d   : > { %630 = vsyncadd (%p462_p1), %s360_s16, 4294967040  ;;  %s17_s13 = sadd.s32 1, %s661_s13   ;;  %s866_s22 = sld [smem:[#allocation8_spill]] }
  0x5e   : > { %p14_p2 = scmp.ge.s32.totalorder %s17_s13, 10   ;;  %s867_s17 = sld [smem:[#allocation9_spill]] }
  0x5f   : > { %s868_s6 = smov %s637_s7  ;;  %s869_s7 = smov %s641_s8 }
  0x60   : > { %s870_s8 = smov %s754_s27  ;;  %s871_s9 = smov %s653_s11 }
  0x61   : > { %s872_s10 = smov %s657_s12  ;;  %16 = sbr.rel (!%p14_p2) target bundleno = 7 (0x7), region = 69 }
  0x63   : > { %s873_s11 = smov %s866_s22 }
  0x64   : > { %s874_s12 = smov %s867_s17 }
  0x66   :  { %366 = vsyncpa [#allocation3], 1 }
  0x67   :  { %368 = vsyncpa [#allocation3 + $0x1], 1 }
  0x68   :  { %369 = vsyncpa [#allocation4], 1 }
  0x69   :  { %371 = vsyncpa [#allocation4 + $0x1], 1 }

</bundles_post_ra>
